<compile_context>
chip_gen: v6e
topology: v6e:2x2x1
jax: 0.10.0
libtpu: 0.0.40
codegen_flags: <defaults>
</compile_context>

<pallas_src>
import jax
import jax.numpy as jnp
from jax.experimental import pallas as pl
from jax.experimental.pallas import tpu as pltpu


def _proj_kernel(x_ref, w_ref, o_ref):
    # x_ref: (C_in, ts)   input pixels for one batch element / spatial tile
    # w_ref: (tn, C_in)   weight tile (C_out tile x C_in)
    # o_ref: (tn, ts)     output tile — spatial on the lane axis (lane-dense)
    o_ref[...] = jnp.dot(
        w_ref[...], x_ref[...], preferred_element_type=jnp.float32
    ).astype(o_ref.dtype)


def _choose_tiles(C_in, C_out, HW, itemsize):
    """Pick (tn, ts) = (C_out tile, spatial tile) against a VMEM budget."""
    # C_out tile: full if modest, otherwise a 128-aligned divisor.
    if C_out <= 512:
        tn = C_out
    else:
        tn = next((c for c in (512, 256, 128) if C_out % c == 0), C_out)

    # Per-step (single-buffer) VMEM budget ~6 MiB; double-buffering doubles it,
    # which still fits every generation's default scoped-VMEM limit.
    budget = 6 * 1024 * 1024
    avail = max(0, budget - tn * C_in * itemsize)
    max_ts = max(128, avail // max(1, (C_in + tn) * itemsize))

    if HW <= max_ts or HW <= 512:
        ts = HW  # full spatial extent: always layout-legal, no edge block
    else:
        ts = min(max_ts, 4096)
        ts = max(128, (ts // 128) * 128)  # lane-aligned tile, cdiv grid masks the tail
    return tn, ts


def projector_block(x_nchw: jax.Array, weight: jax.Array, *, compute_dtype=None) -> jax.Array:
    """1x1 conv, no bias (== nn.Conv2d(C_in, C_out, 1, bias=False)).

    x_nchw:  (B, C_in, H, W)
    weight:  (C_out, C_in, 1, 1)
    returns: (B, C_out, H, W) in x_nchw.dtype
    """
    B, C_in, H, W = x_nchw.shape
    C_out = weight.shape[0]
    HW = H * W
    out_dtype = x_nchw.dtype

    x = x_nchw.reshape(B, C_in, HW)          # NCHW-native, no transpose
    w = weight.reshape(C_out, C_in)
    if compute_dtype is not None:
        x = x.astype(compute_dtype)
        w = w.astype(compute_dtype)

    itemsize = jnp.dtype(x.dtype).itemsize
    tn, ts = _choose_tiles(C_in, C_out, HW, itemsize)

    grid = (B, C_out // tn, pl.cdiv(HW, ts))

    # Double-buffered per-step working set (x tile + out tile + weight tile).
    est_bytes = 2 * (C_in * ts + tn * ts + tn * C_in) * itemsize
    vmem_limit = int(min(48 * 1024 * 1024, max(32 * 1024 * 1024, 3 * est_bytes)))

    cost = pl.CostEstimate(
        flops=2 * B * HW * C_in * C_out,
        transcendentals=0,
        bytes_accessed=(x.size + w.size + B * C_out * HW) * itemsize,
    )

    out = pl.pallas_call(
        _proj_kernel,
        out_shape=jax.ShapeDtypeStruct((B, C_out, HW), out_dtype),
        grid=grid,
        in_specs=[
            # x: (B, C_in, HW) -> block (1[squeezed], C_in, ts)
            pl.BlockSpec((pl.Squeezed(), C_in, ts), lambda b, j, s: (b, 0, s)),
            # w: (C_out, C_in) -> block (tn, C_in)
            pl.BlockSpec((tn, C_in), lambda b, j, s: (j, 0)),
        ],
        # out: (B, C_out, HW) -> block (1[squeezed], tn, ts) — spatial on lanes
        out_specs=pl.BlockSpec((pl.Squeezed(), tn, ts), lambda b, j, s: (b, j, s)),
        compiler_params=pltpu.CompilerParams(
            dimension_semantics=("parallel", "parallel", "parallel"),
            vmem_limit_bytes=vmem_limit,
        ),
        cost_estimate=cost,
    )(x, w)

    return out.reshape(B, C_out, H, W)


if __name__ == "__main__":
    key = jax.random.PRNGKey(0)
    k_x, k_w = jax.random.split(key)

    B, C_in, C_out, H, W = 2, 4, 8, 16, 16

    x = jax.random.normal(k_x, (B, C_in, H, W), dtype=jnp.float32)
    # Conv2d-style init: uniform in [-1/sqrt(fan_in), 1/sqrt(fan_in)]
    bound = 1.0 / jnp.sqrt(C_in * 1 * 1)
    weight = jax.random.uniform(
        k_w, (C_out, C_in, 1, 1), dtype=jnp.float32, minval=-bound, maxval=bound
    )

    out = projector_block(x, weight)
    jax.block_until_ready(out)

    # Reference: 1x1 conv == channel matmul.
    ref = jnp.einsum("bchw,oc->bohw", x, weight.reshape(C_out, C_in))
    assert out.shape == (B, C_out, H, W)
    assert jnp.allclose(out, ref, atol=1e-5, rtol=1e-5)

    print("KERNEL_OK")
</pallas_src>

<mosaic_0001>
module attributes {stable_mosaic.version = 11 : i64} {
  func.func @_proj_kernel(%arg0: i32, %arg1: i32, %arg2: i32, %arg3: memref<1x4x256xf32, #tpu.memory_space<vmem>>, %arg4: memref<8x4xf32, #tpu.memory_space<vmem>>, %arg5: memref<1x8x256xf32, #tpu.memory_space<vmem>>) attributes {dimension_semantics = [#tpu.dimension_semantics<parallel>, #tpu.dimension_semantics<parallel>, #tpu.dimension_semantics<parallel>], iteration_bounds = array<i64: 2, 1, 1>, scalar_prefetch = 0 : i64, scratch_operands = 0 : i64, tpu.core_type = #tpu.core_type<tc>, window_params = [{transform_indices = @transform_0, window_bounds = array<i64: 1, 4, 256>}, {transform_indices = @transform_1, window_bounds = array<i64: 8, 4>}, {transform_indices = @transform_2, window_bounds = array<i64: 1, 8, 256>}]} {
    %c0 = arith.constant 0 : index
    %c0_0 = arith.constant 0 : index
    %0 = vector.load %arg4[%c0, %c0_0] : memref<8x4xf32, #tpu.memory_space<vmem>>, vector<8x4xf32>
    %c0_1 = arith.constant 0 : index
    %c0_2 = arith.constant 0 : index
    %c0_3 = arith.constant 0 : index
    %1 = vector.load %arg3[%c0_1, %c0_2, %c0_3] : memref<1x4x256xf32, #tpu.memory_space<vmem>>, vector<1x4x256xf32>
    %2 = vector.shape_cast %1 : vector<1x4x256xf32> to vector<4x256xf32>
    %cst = arith.constant dense<0.000000e+00> : vector<8x256xf32>
    %3 = tpu.matmul %0, %2, %cst {dimension_numbers = #tpu.dot_dimension_numbers<[1], [0], [0], [1], [0, 0, 1, 1], [], []>} : vector<8x4xf32>, vector<4x256xf32>, vector<8x256xf32> -> vector<8x256xf32>
    %c0_4 = arith.constant 0 : index
    %c0_5 = arith.constant 0 : index
    %c0_6 = arith.constant 0 : index
    %4 = vector.load %arg5[%c0_4, %c0_5, %c0_6] : memref<1x8x256xf32, #tpu.memory_space<vmem>>, vector<1x8x256xf32>
    %5 = vector.shape_cast %4 : vector<1x8x256xf32> to vector<8x256xf32>
    %6 = vector.shape_cast %3 : vector<8x256xf32> to vector<1x8x256xf32>
    tpu.vector_store %arg5[%c0_4, %c0_5, %c0_6], %6 {strides = array<i32>} : memref<1x8x256xf32, #tpu.memory_space<vmem>>, vector<1x8x256xf32>,
    return
  }
  func.func @transform_0(%arg0: i32, %arg1: i32, %arg2: i32) -> (i32, i32, i32) {
    %c0_i32 = arith.constant 0 : i32
    %c0_i32_0 = arith.constant 0 : i32
    return %arg0, %c0_i32, %arg2 : i32, i32, i32
  }
  func.func @transform_1(%arg0: i32, %arg1: i32, %arg2: i32) -> (i32, i32) {
    %c0_i32 = arith.constant 0 : i32
    %c0_i32_0 = arith.constant 0 : i32
    return %arg1, %c0_i32 : i32, i32
  }
  func.func @transform_2(%arg0: i32, %arg1: i32, %arg2: i32) -> (i32, i32, i32) {
    %c0_i32 = arith.constant 0 : i32
    return %arg0, %arg1, %arg2 : i32, i32, i32
  }
}

</mosaic_0001>

<bundles_post_ra>
// kernel: tpu_custom_call.1
= control target key start
LH: loop header
LB: loop body
LE: loop exit
PB: predicated region body
PF: predicated region fallthrough
CT: control target
= control target key end

     0   :  { %7 = vsyncpa [#allocation3], 0  ;;  %s772_s0 = inlined_call_operand.hbm [shape: f32[2,4,256], index: 0, kind: input, shape index: {}]   ;;  %s773_s1 = inlined_call_operand.vmem [shape: f32[8,4], index: 1, kind: input, shape index: {}]   ;;  %s774_s2 = inlined_call_operand.hbm [shape: f32[2,8,256], index: 2, kind: output, shape index: {}]  }
   0x1   :  { %9 = vsyncpa [#allocation3 + $0x1], 0 }
   0x2   :  { %10 = vsyncpa [#allocation4], 0 }
   0x3   :  { %12 = vsyncpa [#allocation4 + $0x1], 0  ;;  %s628_s9 = smov 0   ;;  %s630_s10 = smov 0  }
   0x4   :  { %s632_s11 = smov 0   ;;  %s634_s12 = smov 0  }
   0x5   :  { %s636_s13 = smov 0   ;;  %s638_s14 = smov 0  }
   0x6 LB: > { %s415_s15 = sadd.s32 4294967295, %s608_s14   ;;  %s416_s16 = sadd.s32 4294967294, %s608_s14   ;;  %s608_s14 = sphi %s638_s14, %s18_s14   ;;  %s604_s13 = sphi %s636_s13, %s786_s13   ;;  %s600_s12 = sphi %s634_s12, %s785_s12   ;;  %s596_s11 = sphi %s632_s11, %s784_s11   ;;  %s592_s10 = sphi %s630_s10, %s783_s10   ;;  %s588_s9 = sphi %s628_s9, %s782_s9  }
   0x7   : > { %s37_s17 = sadd.s32 1, %s604_s13  ;;  %s46_s18 = sadd.s32 1, %s596_s11 }
   0x8   : > { %p39_p0 = scmp.ge.s32.totalorder %s37_s17, 2  ;;  %p53_p1 = scmp.ne.s32.totalorder %s596_s11, %s592_s10 }
   0x9   : > { %p54_p2 = scmp.eq.s32.totalorder %s608_s14, 0  ;;  %p59_p3 = scmp.ne.s32.totalorder %s592_s10, %s588_s9 }
   0xa   : > { %s788_s17 = smov (%p39_p0, %s37_s17), 0  ;;  %p60_p5 = scmp.eq.s32.totalorder %s415_s15, 0 }
   0xb   : > { %p669_p4 = por %p54_p2, %p53_p1  ;;  %s41_s20 = ssub.s32 %s604_s13, %s788_s17 }
   0xc   : > { %p113_p6 = scmp.eq.s32.totalorder %s415_s15, 1  ;;  %p44_p7 = scmp.eq.s32.totalorder %s41_s20, 0 }
   0xd   : > { %p675_p8 = por %p60_p5, %p59_p3  ;;  %p119_p10 = scmp.eq.s32.totalorder %s416_s16, 1 }
   0xe   : > { %p679_p9 = por %p113_p6, %p53_p1  ;;  %p448_p13 = scmp.lt.s32.totalorder %s608_s14, 2 }
   0xf   : > { %s684_s23 = scalar_select %p44_p7, %s596_s11, %s46_s18  }
  0x10   : > { %p686_p11 = por %p119_p10, %p59_p3  ;;  %s146_s25 = sand.u32 1, %s596_s11  }
  0x11   : > { %s420_s26 = sshll.u32 %s146_s25, 3  ;;  %s434_s27 = sshll.u32 %s604_s13, 7 }
  0x12   : > { %s778_s24 = scalar_select %p686_p11, 1, 0 }
  0x13   : > { %s158_s30 = scalar_lea.hbm %s772_s0, %s434_s27  ;;  %s150_s3 = scalar_lea.vmem [#allocation2], %s420_s26 }
  0x14   : > { %s160_s4 = sshll.u32 %s150_s3, 4  ;;  %p699_p0 = pnand %p448_p13, %p669_p4  ;;  %s161_s4 = int_to_ptr.vmem [resolvable:$true] %s160_s4 }
  0x15   : > { %p423_p1 = scmp.ge.s32.totalorder %s608_s14, 1  ;;  %p165_p2 = scmp.lt.s32.totalorder %s608_s14, 3 }
  0x16   : > { %s147_s6 = scalar_lea.sflag [#allocation3], %s146_s25  ;;  %p502_p3 = pneg %p699_p0 }
  0x17   : > { %s513_s7 = scalar_lea.vmem %s161_s4, 128  ;;  %s610_s8 = smov [#allocation2]  }
  0x18   : > { %p514_p5 = scmp.ne.s32.totalorder %s161_s4, %s513_s7  ;;  %s518_s15 = sshll.u32 %s610_s8, 4  ;;  %s519_s15 = int_to_ptr.vmem [resolvable:$false] %s518_s15 }
  0x19   : > { %s520_s16 = scalar_lea.vmem %s519_s15, 256  ;;  %p521_p10 = scmp.lt.s32.totalorder %s161_s4, %s519_s15 }
  0x1a   : > { %p516_p6 = pnand %p514_p5, %p502_p3  ;;  %p522_p12 = scmp.lt.s32.totalorder %s520_s16, %s513_s7 }
  0x1c   : > { %p517_p7 = pneg %p516_p6  ;;  %p523_p4 = por %p522_p12, %p521_p10 }
  0x1e   : > { %p524_p13 = pnand %p523_p4, %p517_p7 }
  0x20   : > { %527 = shalt.err (!%p524_p13)
}
  0x21   : > { %443 = dma.hbm_to_vmem [thread:$0]  (!%p699_p0), %s158_s30, 128, %s161_s4, %s147_s6  }
  0x22   : > { %p166_p11 = pnand %p423_p1, %p165_p2 }
  0x23   : > { %s714_s18 = sand.u32 (!%p166_p11), 1, %s592_s10  }
  0x24   : > { %169 = sbr.rel (%p166_p11) target bundleno = 255 (0xff), region = 28  ;;  %s424_s19 = sshll.u32 (!%p166_p11), %s714_s18, 3 }
  0x25   : > { %s172_s20 = scalar_lea.sflag (!%p166_p11), [#allocation3], %s714_s18  ;;  %s175_s25 = scalar_lea.vmem (!%p166_p11), [#allocation2], %s424_s19 }
  0x29   : > { %579 = dma.done.wait (%p675_p8), %s172_s20, 128  }
  0x2a   : > { %581 = vsyncadd (%p675_p8), %s172_s20, 4294967168  ;;  %v611_v0 = vmov 0.0   ;;  %v207_v1 = vld [vmem:[%s175_s25] sm:$0xff]  ;;  %vm214_vm0 = vcmask 1043456   ;;  %vm210_vm1 = vcmask 31744   ;;  %s425_s28 = sshll.u32 %s714_s18, 4 }
  0x2b   : > { %283 = vmatprep.mubr.f32.mxu0 %v611_v0  ;;  %v209_v2 = vcombine.high %v207_v1, %v207_v1  ;;  %v206_v3 = vld [vmem:[%s773_s1] sm:$0xff]  ;;  %s199_s21 = scalar_lea.vmem [#allocation5], %s425_s28  ;;  %s435_s30 = sshll.u32 %s600_s12, 8 }
  0x2c   : > { %s311_s29 = sshll.u32 %s199_s21, 4  ;;  %s309_s5 = scalar_lea.hbm %s774_s2, %s435_s30  ;;  %s727_s29 = int_to_ptr.vmem [resolvable:$true] %s311_s29 }
  0x2d   : > { %426 = vmatprep.subr.msk.mxu0 %vm214_vm0, %v209_v2  ;;  %s293_s6 = scalar_lea.sflag [#allocation4], %s714_s18  ;;  %s528_s7 = scalar_lea.vmem %s727_s29, 256 }
  0x2e   : > { %427 = vmatpush1.msk.msra.mxu0 %vm214_vm0, %v207_v1  ;;  %p529_p8 = scmp.ne.s32.totalorder %s727_s29, %s528_s7  ;;  %s612_s12 = smov [#allocation5]  }
  0x2f   : > { %428 = vmatmul.mubr.msk.f32.vlgmr.msra.gmra.mxu0 %vm210_vm1, %v206_v3  ;;  %s532_s8 = sshll.u32 %s612_s12, 4  ;;  %s533_s8 = int_to_ptr.vmem [resolvable:$false] %s532_s8 }
  0x30   : > { %p530_p11 = pnand %p529_p8, %p679_p9  ;;  %s534_s15 = scalar_lea.vmem %s533_s8, 512 }
  0x31   : > { %p535_p0 = scmp.lt.s32.totalorder %s727_s29, %s533_s8  ;;  %p536_p1 = scmp.lt.s32.totalorder %s534_s15, %s528_s7 }
  0x32   : > { %p531_p12 = pneg %p530_p11 }
  0x33   : > { %p537_p2 = por %p536_p1, %p535_p0 }
  0x35   : > { %p538_p3 = pnand %p537_p2, %p531_p12 }
  0xef   : > { %v285_v4 = vpop.f32.mrf.mxu0 }
  0xf0   : > { %290 = vst [vmem:[%s199_s21] sm:$0xff] %v285_v4 }
  0xf1   : > { %v287_v5 = vpop.f32.mrf.mxu0 }
  0xf2   : > { %291 = vst [vmem:[%s199_s21 + $0x8] sm:$0xff] %v287_v5 }
  0xf3   : > { %541 = shalt.err (!%p538_p3)
}
  0xf4   : > { %s542_s16 = scalar_lea.hbm %s309_s5, 256  ;;  %s546_s20 = scalar_lea.hbm %s774_s2, 512 }
  0xf5   : > { %p543_p5 = scmp.ne.s32.totalorder %s309_s5, %s542_s16  ;;  %p547_p10 = scmp.lt.s32.totalorder %s309_s5, %s774_s2 }
  0xf6   : > { %p548_p4 = scmp.lt.s32.totalorder %s546_s20, %s542_s16 }
  0xf7   : > { %p544_p6 = pnand %p543_p5, %p679_p9 }
  0xf8   : > { %p549_p13 = por %p548_p4, %p547_p10 }
  0xf9   : > { %p545_p7 = pneg %p544_p6 }
  0xfb   : > { %p550_p8 = pnand %p549_p13, %p545_p7 }
  0xfd   : > { %553 = shalt.err (!%p550_p8)
}
  0xfe   : > { %438 = dma.vmem_to_hbm [thread:$0]  (%p679_p9), %s727_s29, 256, %s309_s5, %s293_s6  }
  0xff PF: > { %s323_s27 = sand.u32 1, %s588_s9   ;;  %p780_p11 = scmp.ne.s32.totalorder %s778_s24, 0 }
 0x100   : > { %p781_p12 = scmp.ge.s32.totalorder %s608_s14, 2  ;;  %s324_s28 = scalar_lea.sflag [#allocation4], %s323_s27 }
 0x102   : > { %p445_p0 = pnand %p781_p12, %p780_p11 }
 0x104   : > { %p446_p1 = pneg %p445_p0 }
 0x106   : > { %583 = dma.done.wait (%p446_p1), %s324_s28, 256  }
 0x107   : > { %585 = vsyncadd (%p446_p1), %s324_s28, 4294967040  ;;  %s18_s14 = sadd.s32 1, %s608_s14   ;;  %s782_s9 = smov %s592_s10 }
 0x108   : > { %p15_p2 = scmp.ge.s32.totalorder %s18_s14, 4   ;;  %s783_s10 = smov %s596_s11 }
 0x109   : > { %s784_s11 = smov %s684_s23  ;;  %s785_s12 = smov %s604_s13 }
 0x10a   : > { %s786_s13 = smov %s788_s17  ;;  %17 = sbr.rel (!%p15_p2) target bundleno = 6 (0x6), region = 76 }
 0x10f   :  { %329 = vsyncpa [#allocation3], 1 }
 0x110   :  { %331 = vsyncpa [#allocation3 + $0x1], 1 }
 0x111   :  { %332 = vsyncpa [#allocation4], 1 }
 0x112   :  { %334 = vsyncpa [#allocation4 + $0x1], 1 }

</bundles_post_ra>
